<compile_context>
chip_gen: v7x
topology: tpu7x:2x2x1
jax: 0.10.0
libtpu: 0.0.40
codegen_flags: <defaults>
</compile_context>

<pallas_src>
import numpy as np
import jax
import jax.numpy as jnp
from jax.experimental import pallas as pl
from jax.experimental.pallas import tpu as pltpu  # noqa: F401  (scaling knobs, see notes)

EPS = 1e-5  # nn.LayerNorm default eps


# ------------------------------ Pallas kernel --------------------------------
def patch_merging_kernel(x_ref, w02_ref, w13_ref, bias_ref, o_ref):
    """Fused 2x2 gather + LayerNorm + reduction GEMM.

    x_ref   : (B*H/2, 2, W/2, 2C)  free view of the input; dim 1 = h-parity
    w02_ref : (2C, 2C)  affine-folded reduction rows for the [x0 | x2] features
    w13_ref : (2C, 2C)  affine-folded reduction rows for the [x1 | x3] features
    bias_ref: (1, 2C)   beta @ W
    o_ref   : (rows, 2C) with rows = B * H/2 * W/2
    """
    rows, c2 = o_ref.shape
    inv_n = 1.0 / (2.0 * c2)  # 1 / (4C)

    # In-VMEM 2x2 gather: each slab is a static strided tile read plus a
    # layout-free leading-dim collapse ((B*H/2, W/2, 2C) -> (rows, 2C), native
    # (8,128) tiling).  No HBM round trip, no wrapper transpose.
    x02 = x_ref[:, 0, :, :].reshape(rows, c2)  # [x0 | x2] per merged token
    x13 = x_ref[:, 1, :, :].reshape(rows, c2)  # [x1 | x3] per merged token

    # LayerNorm statistics over the full 4C features (f32, biased variance).
    mean = (jnp.sum(x02, axis=-1, keepdims=True)
            + jnp.sum(x13, axis=-1, keepdims=True)) * inv_n
    d02 = x02 - mean
    d13 = x13 - mean
    var = (jnp.sum(d02 * d02, axis=-1, keepdims=True)
           + jnp.sum(d13 * d13, axis=-1, keepdims=True)) * inv_n
    inv_std = jax.lax.rsqrt(var + EPS)  # EUP slot

    # Affine-folded reduction: ((x - mean) * inv_std) @ (gamma (.) W) + beta @ W.
    # (bf16 MXU operands are the next lever at production sizes; f32 kept here.)
    o_ref[...] = (
        jnp.dot(d02 * inv_std, w02_ref[...], preferred_element_type=jnp.float32)
        + jnp.dot(d13 * inv_std, w13_ref[...], preferred_element_type=jnp.float32)
        + bias_ref[...]
    )


# ------------------------------- wrapper --------------------------------------
def patch_merging_pallas(x, gamma, beta, w_red, *, H, W):
    """PatchMerging forward.  x: (B, H*W, C); gamma/beta: (4C,); w_red: (4C, 2C)."""
    B, L, C = x.shape
    assert L == H * W, "input feature has wrong size"
    assert H % 2 == 0 and W % 2 == 0, f"x size ({H}*{W}) are not even."
    c4, c2 = w_red.shape
    assert c4 == 4 * C and c2 == 2 * C
    # Lane/sublane alignment assumed by this fused kernel.
    assert (2 * C) % 128 == 0 and (W // 2) % 8 == 0

    # ---- weight prep (constant-foldable for real model parameters) ----------
    w_aff = gamma.reshape(c4, 1) * w_red                       # gamma (.) W : (4C, 2C)
    bias = jnp.dot(beta.reshape(1, c4), w_red,
                   precision=jax.lax.Precision.HIGHEST)        # beta @ W : (1, 2C)
    # Split W' into the row blocks matching the in-kernel slabs:
    #   even-h slab features are [x0 | x2] -> W rows [0:C]  ++ [2C:3C]
    #   odd-h  slab features are [x1 | x3] -> W rows [C:2C] ++ [3C:4C]
    w02 = jnp.concatenate([w_aff[0:C], w_aff[2 * C:3 * C]], axis=0)       # (2C, 2C)
    w13 = jnp.concatenate([w_aff[C:2 * C], w_aff[3 * C:4 * C]], axis=0)   # (2C, 2C)

    # ---- activations: free (no-copy) reshape only -----------------------------
    # (B, H*W, C) -> (B*H/2, 2, W/2, 2C): dim 1 is the h-parity inside each 2x2
    # patch; the last dim packs [w even | w odd] channels contiguously.
    x4 = x.reshape(B * H // 2, 2, W // 2, 2 * C)

    rows = B * (H // 2) * (W // 2)
    out = pl.pallas_call(
        patch_merging_kernel,
        out_shape=jax.ShapeDtypeStruct((rows, c2), jnp.float32),
        grid=(1,),  # whole problem in one grid step; weights loaded exactly once
        in_specs=[
            pl.BlockSpec(x4.shape, lambda i: (0, 0, 0, 0)),
            pl.BlockSpec((c2, c2), lambda i: (0, 0)),
            pl.BlockSpec((c2, c2), lambda i: (0, 0)),
            pl.BlockSpec((1, c2), lambda i: (0, 0)),
        ],
        out_specs=pl.BlockSpec((rows, c2), lambda i: (0, 0)),
        cost_estimate=pl.CostEstimate(
            flops=2 * rows * c4 * c2 + 8 * rows * c4,
            transcendentals=rows,
            bytes_accessed=4 * (x4.size + w02.size + w13.size + bias.size + rows * c2),
        ),
    )(x4, w02, w13, bias)
    return out.reshape(B, (H // 2) * (W // 2), c2)


# ---------------------------- pure-JAX reference ------------------------------
def patch_merging_reference(x, gamma, beta, w_red, H, W):
    B, L, C = x.shape
    xg = x.reshape(B, H, W, C)
    x0 = xg[:, 0::2, 0::2, :]
    x1 = xg[:, 1::2, 0::2, :]
    x2 = xg[:, 0::2, 1::2, :]
    x3 = xg[:, 1::2, 1::2, :]
    xc = jnp.concatenate([x0, x1, x2, x3], axis=-1).reshape(B, -1, 4 * C)
    mu = xc.mean(-1, keepdims=True)
    va = ((xc - mu) ** 2).mean(-1, keepdims=True)
    xn = (xc - mu) / jnp.sqrt(va + EPS) * gamma + beta
    return jnp.einsum("blk,kd->bld", xn, w_red,
                      precision=jax.lax.Precision.HIGHEST)


# --------------------------------- main ---------------------------------------
if __name__ == "__main__":
    B, H, W, C = 2, 16, 16, 64  # 4C = 256, 2C = 128 (lane-dense)

    key = jax.random.PRNGKey(0)
    k0, k1, k2, k3 = jax.random.split(key, 4)

    x = jax.random.normal(k0, (B, H * W, C), jnp.float32)
    # nn.LayerNorm(4C) affine params (non-trivial values exercise the fold path)
    gamma = 1.0 + 0.1 * jax.random.normal(k1, (4 * C,), jnp.float32)
    beta = 0.1 * jax.random.normal(k2, (4 * C,), jnp.float32)
    # nn.Linear(4C, 2C, bias=False) weight stored as (in, out) so kernel does x @ W
    w_red = 0.02 * jax.random.normal(k3, (4 * C, 2 * C), jnp.float32)

    fn = jax.jit(patch_merging_pallas, static_argnames=("H", "W"))
    out = jax.block_until_ready(fn(x, gamma, beta, w_red, H=H, W=W))

    ref = jax.block_until_ready(patch_merging_reference(x, gamma, beta, w_red, H, W))
    np.testing.assert_allclose(np.asarray(out), np.asarray(ref),
                               rtol=1e-3, atol=1e-3)

    print("KERNEL_OK")
</pallas_src>

<mosaic_0001>
module attributes {stable_mosaic.version = 11 : i64} {
  func.func @patch_merging_kernel(%arg0: i32, %arg1: memref<16x2x8x128xf32, #tpu.memory_space<vmem>>, %arg2: memref<128x128xf32, #tpu.memory_space<vmem>>, %arg3: memref<128x128xf32, #tpu.memory_space<vmem>>, %arg4: memref<1x128xf32, #tpu.memory_space<vmem>>, %arg5: memref<128x128xf32, #tpu.memory_space<vmem>>) attributes {dimension_semantics = [#tpu.dimension_semantics<arbitrary>], iteration_bounds = array<i64: 1>, scalar_prefetch = 0 : i64, scratch_operands = 0 : i64, tpu.core_type = #tpu.core_type<tc>, window_params = [{pipeline_mode = #tpu.pipeline_mode<synchronous>, transform_indices = @transform_0, window_bounds = array<i64: 16, 2, 8, 128>}, {pipeline_mode = #tpu.pipeline_mode<synchronous>, transform_indices = @transform_1, window_bounds = array<i64: 128, 128>}, {pipeline_mode = #tpu.pipeline_mode<synchronous>, transform_indices = @transform_2, window_bounds = array<i64: 128, 128>}, {pipeline_mode = #tpu.pipeline_mode<synchronous>, transform_indices = @transform_3, window_bounds = array<i64: 1, 128>}, {pipeline_mode = #tpu.pipeline_mode<synchronous>, transform_indices = @transform_4, window_bounds = array<i64: 128, 128>}]} {
    %c0 = arith.constant 0 : index
    %c0_0 = arith.constant 0 : index
    %c0_1 = arith.constant 0 : index
    %c0_2 = arith.constant 0 : index
    %0 = vector.load %arg1[%c0, %c0_0, %c0_1, %c0_2] : memref<16x2x8x128xf32, #tpu.memory_space<vmem>>, vector<16x1x8x128xf32>
    %1 = vector.shape_cast %0 : vector<16x1x8x128xf32> to vector<16x8x128xf32>
    %2 = vector.shape_cast %1 : vector<16x8x128xf32> to vector<128x128xf32>
    %c0_3 = arith.constant 0 : index
    %c1 = arith.constant 1 : index
    %c0_4 = arith.constant 0 : index
    %c0_5 = arith.constant 0 : index
    %3 = vector.load %arg1[%c0_3, %c1, %c0_4, %c0_5] : memref<16x2x8x128xf32, #tpu.memory_space<vmem>>, vector<16x1x8x128xf32>
    %4 = vector.shape_cast %3 : vector<16x1x8x128xf32> to vector<16x8x128xf32>
    %5 = vector.shape_cast %4 : vector<16x8x128xf32> to vector<128x128xf32>
    %cst = arith.constant dense<0.000000e+00> : vector<128xf32>
    %6 = vector.multi_reduction <add>, %2, %cst [1] : vector<128x128xf32> to vector<128xf32>
    %7 = vector.shape_cast %6 : vector<128xf32> to vector<128x1xf32>
    %cst_6 = arith.constant dense<0.000000e+00> : vector<128xf32>
    %8 = vector.multi_reduction <add>, %5, %cst_6 [1] : vector<128x128xf32> to vector<128xf32>
    %9 = vector.shape_cast %8 : vector<128xf32> to vector<128x1xf32>
    %10 = arith.addf %7, %9 : vector<128x1xf32>
    %cst_7 = arith.constant 3.906250e-03 : f32
    %11 = vector.broadcast %cst_7 : f32 to vector<128x1xf32>
    %12 = arith.mulf %10, %11 : vector<128x1xf32>
    %13 = vector.broadcast %12 : vector<128x1xf32> to vector<128x128xf32>
    %14 = arith.subf %2, %13 : vector<128x128xf32>
    %15 = vector.broadcast %12 : vector<128x1xf32> to vector<128x128xf32>
    %16 = arith.subf %5, %15 : vector<128x128xf32>
    %17 = arith.mulf %14, %14 : vector<128x128xf32>
    %cst_8 = arith.constant dense<0.000000e+00> : vector<128xf32>
    %18 = vector.multi_reduction <add>, %17, %cst_8 [1] : vector<128x128xf32> to vector<128xf32>
    %19 = vector.shape_cast %18 : vector<128xf32> to vector<128x1xf32>
    %20 = arith.mulf %16, %16 : vector<128x128xf32>
    %cst_9 = arith.constant dense<0.000000e+00> : vector<128xf32>
    %21 = vector.multi_reduction <add>, %20, %cst_9 [1] : vector<128x128xf32> to vector<128xf32>
    %22 = vector.shape_cast %21 : vector<128xf32> to vector<128x1xf32>
    %23 = arith.addf %19, %22 : vector<128x1xf32>
    %cst_10 = arith.constant 3.906250e-03 : f32
    %24 = vector.broadcast %cst_10 : f32 to vector<128x1xf32>
    %25 = arith.mulf %23, %24 : vector<128x1xf32>
    %cst_11 = arith.constant 9.99999974E-6 : f32
    %26 = vector.broadcast %cst_11 : f32 to vector<128x1xf32>
    %27 = arith.addf %25, %26 : vector<128x1xf32>
    %28 = math.rsqrt %27 : vector<128x1xf32>
    %29 = vector.broadcast %28 : vector<128x1xf32> to vector<128x128xf32>
    %30 = arith.mulf %14, %29 : vector<128x128xf32>
    %c0_12 = arith.constant 0 : index
    %c0_13 = arith.constant 0 : index
    %31 = vector.load %arg2[%c0_12, %c0_13] : memref<128x128xf32, #tpu.memory_space<vmem>>, vector<128x128xf32>
    %cst_14 = arith.constant dense<0.000000e+00> : vector<128x128xf32>
    %32 = tpu.matmul %30, %31, %cst_14 {dimension_numbers = #tpu.dot_dimension_numbers<[1], [0], [0], [1], [0, 0, 1, 1], [], []>} : vector<128x128xf32>, vector<128x128xf32>, vector<128x128xf32> -> vector<128x128xf32>
    %33 = vector.broadcast %28 : vector<128x1xf32> to vector<128x128xf32>
    %34 = arith.mulf %16, %33 : vector<128x128xf32>
    %c0_15 = arith.constant 0 : index
    %c0_16 = arith.constant 0 : index
    %35 = vector.load %arg3[%c0_15, %c0_16] : memref<128x128xf32, #tpu.memory_space<vmem>>, vector<128x128xf32>
    %cst_17 = arith.constant dense<0.000000e+00> : vector<128x128xf32>
    %36 = tpu.matmul %34, %35, %cst_17 {dimension_numbers = #tpu.dot_dimension_numbers<[1], [0], [0], [1], [0, 0, 1, 1], [], []>} : vector<128x128xf32>, vector<128x128xf32>, vector<128x128xf32> -> vector<128x128xf32>
    %37 = arith.addf %32, %36 : vector<128x128xf32>
    %c0_18 = arith.constant 0 : index
    %c0_19 = arith.constant 0 : index
    %38 = vector.load %arg4[%c0_18, %c0_19] : memref<1x128xf32, #tpu.memory_space<vmem>>, vector<1x128xf32>
    %39 = vector.broadcast %38 : vector<1x128xf32> to vector<128x128xf32>
    %40 = arith.addf %37, %39 : vector<128x128xf32>
    %c0_20 = arith.constant 0 : index
    %c0_21 = arith.constant 0 : index
    %41 = vector.load %arg5[%c0_20, %c0_21] : memref<128x128xf32, #tpu.memory_space<vmem>>, vector<128x128xf32>
    tpu.vector_store %arg5[%c0_20, %c0_21], %40 {strides = array<i32>} : memref<128x128xf32, #tpu.memory_space<vmem>>, vector<128x128xf32>,
    return
  }
  func.func @transform_0(%arg0: i32) -> (i32, i32, i32, i32) {
    %c0_i32 = arith.constant 0 : i32
    %c0_i32_0 = arith.constant 0 : i32
    %c0_i32_1 = arith.constant 0 : i32
    %c0_i32_2 = arith.constant 0 : i32
    %c0_i32_3 = arith.constant 0 : i32
    return %c0_i32, %c0_i32_0, %c0_i32_1, %c0_i32_2 : i32, i32, i32, i32
  }
  func.func @transform_1(%arg0: i32) -> (i32, i32) {
    %c0_i32 = arith.constant 0 : i32
    %c0_i32_0 = arith.constant 0 : i32
    %c0_i32_1 = arith.constant 0 : i32
    return %c0_i32, %c0_i32_0 : i32, i32
  }
  func.func @transform_2(%arg0: i32) -> (i32, i32) {
    %c0_i32 = arith.constant 0 : i32
    %c0_i32_0 = arith.constant 0 : i32
    %c0_i32_1 = arith.constant 0 : i32
    return %c0_i32, %c0_i32_0 : i32, i32
  }
  func.func @transform_3(%arg0: i32) -> (i32, i32) {
    %c0_i32 = arith.constant 0 : i32
    %c0_i32_0 = arith.constant 0 : i32
    %c0_i32_1 = arith.constant 0 : i32
    return %c0_i32, %c0_i32_0 : i32, i32
  }
  func.func @transform_4(%arg0: i32) -> (i32, i32) {
    %c0_i32 = arith.constant 0 : i32
    %c0_i32_0 = arith.constant 0 : i32
    %c0_i32_1 = arith.constant 0 : i32
    return %c0_i32, %c0_i32_0 : i32, i32
  }
}

</mosaic_0001>

<bundles_post_ra>
// kernel: patch_merging_pallas.1
= control target key start
LH: loop header
LB: loop body
LE: loop exit
PB: predicated region body
PF: predicated region fallthrough
CT: control target
= control target key end

     0   :  { %s1621_s0 = inlined_call_operand.vmem [shape: f32[16,2,8,128], index: 0, kind: input, shape index: {}]   ;;  %s1622_s1 = inlined_call_operand.vmem [shape: f32[128,128], index: 1, kind: input, shape index: {}]   ;;  %s1623_s2 = inlined_call_operand.vmem [shape: f32[128,128], index: 2, kind: input, shape index: {}]   ;;  %s1624_s3 = inlined_call_operand.vmem [shape: f32[1,128], index: 3, kind: input, shape index: {}]   ;;  %s1625_s4 = inlined_call_operand.hbm [shape: f32[128,128], index: 4, kind: output, shape index: {}]  }
   0x1   :  { %v1111_v0 = vld [vmem:[%s1621_s0 + $0x10] sm:$0xff]  ;;  %v1116_v1 = vld [vmem:[%s1621_s0] sm:$0xff]  ;;  %v1123_v2 = vld [vmem:[%s1621_s0 + $0x18] sm:$0xff] }
   0x2   :  { %53 = vadd.xlane.f32.xlu1 %v1111_v0  ;;  %51 = vadd.xlane.f32.xlu0 %v1116_v1  ;;  %v1128_v3 = vld [vmem:[%s1621_s0 + $0x8] sm:$0xff]  ;;  %v1140_v5 = vld [vmem:[%s1621_s0 + $0x20] sm:$0xff]  ;;  %v1147_v6 = vld [vmem:[%s1621_s0 + $0x38] sm:$0xff] }
   0x3   :  { %v1135_v4 = vld [vmem:[%s1621_s0 + $0x28] sm:$0xff]  ;;  %v1152_v7 = vld [vmem:[%s1621_s0 + $0x30] sm:$0xff] }
   0x6   :  { %85 = vadd.xlane.f32.xlu1 %v1123_v2  ;;  %83 = vadd.xlane.f32.xlu0 %v1128_v3 }
   0xa   :  { %87 = vadd.xlane.f32.xlu1 %v1135_v4  ;;  %55 = vadd.xlane.f32.xlu0 %v1140_v5 }
   0xb   :  { %9 = vsyncpa [#allocation3], 0  ;;  %v1159_v8 = vld [vmem:[%s1621_s0 + $0x48] sm:$0xff]  ;;  %v1164_v9 = vld [vmem:[%s1621_s0 + $0x40] sm:$0xff] }
   0xc   :  { %v1171_v10 = vld [vmem:[%s1621_s0 + $0x58] sm:$0xff]  ;;  %v1176_v11 = vld [vmem:[%s1621_s0 + $0x50] sm:$0xff]  ;;  %v1183_v12 = vld [vmem:[%s1621_s0 + $0x68] sm:$0xff] }
   0xd   :  { %v1188_v13 = vld [vmem:[%s1621_s0 + $0x60] sm:$0xff]  ;;  %v1195_v14 = vld [vmem:[%s1621_s0 + $0x78] sm:$0xff]  ;;  %v1200_v15 = vld [vmem:[%s1621_s0 + $0x70] sm:$0xff] }
   0xe   :  { %89 = vadd.xlane.f32.xlu1 %v1147_v6  ;;  %57 = vadd.xlane.f32.xlu0 %v1152_v7  ;;  %v1207_v16 = vld [vmem:[%s1621_s0 + $0x88] sm:$0xff]  ;;  %v1212_v17 = vld [vmem:[%s1621_s0 + $0x80] sm:$0xff]  ;;  %v1219_v18 = vld [vmem:[%s1621_s0 + $0x98] sm:$0xff] }
   0xf   :  { %v1224_v19 = vld [vmem:[%s1621_s0 + $0x90] sm:$0xff]  ;;  %v1231_v20 = vld [vmem:[%s1621_s0 + $0xa8] sm:$0xff]  ;;  %v1236_v21 = vld [vmem:[%s1621_s0 + $0xa0] sm:$0xff] }
  0x10   :  { %v1243_v22 = vld [vmem:[%s1621_s0 + $0xb8] sm:$0xff]  ;;  %v1248_v23 = vld [vmem:[%s1621_s0 + $0xb0] sm:$0xff]  ;;  %v1255_v24 = vld [vmem:[%s1621_s0 + $0xc8] sm:$0xff] }
  0x11   :  { %v1260_v25 = vld [vmem:[%s1621_s0 + $0xc0] sm:$0xff]  ;;  %v1267_v26 = vld [vmem:[%s1621_s0 + $0xd8] sm:$0xff]  ;;  %v1272_v27 = vld [vmem:[%s1621_s0 + $0xd0] sm:$0xff] }
  0x12   :  { %91 = vadd.xlane.f32.xlu1 %v1159_v8  ;;  %59 = vadd.xlane.f32.xlu0 %v1164_v9  ;;  %v1279_v28 = vld [vmem:[%s1621_s0 + $0xe8] sm:$0xff]  ;;  %v1284_v29 = vld [vmem:[%s1621_s0 + $0xe0] sm:$0xff]  ;;  %v1291_v30 = vld [vmem:[%s1621_s0 + $0xf8] sm:$0xff] }
  0x13   :  { %v1296_v31 = vld [vmem:[%s1621_s0 + $0xf0] sm:$0xff]  ;;  %v387_v32 = vld [vmem:[%s1623_s2] sm:$0xff]  ;;  %v388_v33 = vld [vmem:[%s1623_s2 + $0x8] sm:$0xff] }
  0x14   :  { %v355_v34 = vld [vmem:[%s1622_s1] sm:$0xff]  ;;  %v941_v35 = vpack.c.bf16 %v388_v33, %v387_v32  ;;  %v356_v36 = vld [vmem:[%s1622_s1 + $0x8] sm:$0xff]  ;;  %v389_v37 = vld [vmem:[%s1623_s2 + $0x10] sm:$0xff] }
  0x15   :  { %v390_v38 = vld [vmem:[%s1623_s2 + $0x18] sm:$0xff]  ;;  %v973_v39 = vpack.c.bf16 %v356_v36, %v355_v34  ;;  %v357_v41 = vld [vmem:[%s1622_s1 + $0x10] sm:$0xff]  ;;  %v391_v43 = vld [vmem:[%s1623_s2 + $0x20] sm:$0xff] }
  0x16   :  { %93 = vadd.xlane.f32.xlu1 %v1171_v10  ;;  %61 = vadd.xlane.f32.xlu0 %v1176_v11  ;;  %v945_v40 = vpack.c.bf16 %v390_v38, %v389_v37  ;;  %v358_v42 = vld [vmem:[%s1622_s1 + $0x18] sm:$0xff]  ;;  %v392_v45 = vld [vmem:[%s1623_s2 + $0x28] sm:$0xff]  ;;  %v359_v46 = vld [vmem:[%s1622_s1 + $0x20] sm:$0xff] }
  0x17   :  { %942 = vmatprep.subr.bf16.mxu1 %v941_v35  ;;  %v977_v44 = vpack.c.bf16 %v358_v42, %v357_v41  ;;  %v360_v47 = vld [vmem:[%s1622_s1 + $0x28] sm:$0xff]  ;;  %974 = vmatprep.subr.bf16.mxu0 %v973_v39  ;;  %v949_v48 = vpack.c.bf16 %v392_v45, %v391_v43 }
  0x18   :  { %944 = vmatpush3.bf16.msra.mxu1 %v941_v35  ;;  %976 = vmatpush3.bf16.msra.mxu0 %v973_v39  ;;  %v981_v49 = vpack.c.bf16 %v360_v47, %v359_v46 }
  0x19   :  { %946 = vmatprep.subr.bf16.mxu1 %v945_v40  ;;  %978 = vmatprep.subr.bf16.mxu0 %v977_v44 }
  0x1a   :  { %95 = vadd.xlane.f32.xlu1 %v1183_v12  ;;  %63 = vadd.xlane.f32.xlu0 %v1188_v13 }
  0x1c   :  { %948 = vmatpush3.bf16.msra.mxu1 %v945_v40  ;;  %980 = vmatpush3.bf16.msra.mxu0 %v977_v44 }
  0x1d   :  { %950 = vmatprep.subr.bf16.mxu1 %v949_v48  ;;  %982 = vmatprep.subr.bf16.mxu0 %v981_v49 }
  0x1e   :  { %97 = vadd.xlane.f32.xlu1 %v1195_v14  ;;  %65 = vadd.xlane.f32.xlu0 %v1200_v15 }
  0x20   :  { %952 = vmatpush3.bf16.msra.mxu1 %v949_v48  ;;  %984 = vmatpush3.bf16.msra.mxu0 %v981_v49 }
  0x22   :  { %99 = vadd.xlane.f32.xlu1 %v1207_v16  ;;  %67 = vadd.xlane.f32.xlu0 %v1212_v17 }
  0x26   :  { %101 = vadd.xlane.f32.xlu1 %v1219_v18  ;;  %69 = vadd.xlane.f32.xlu0 %v1224_v19 }
  0x2a   :  { %103 = vadd.xlane.f32.xlu1 %v1231_v20  ;;  %71 = vadd.xlane.f32.xlu0 %v1236_v21 }
  0x2e   :  { %105 = vadd.xlane.f32.xlu1 %v1243_v22  ;;  %73 = vadd.xlane.f32.xlu0 %v1248_v23 }
  0x32   :  { %107 = vadd.xlane.f32.xlu1 %v1255_v24  ;;  %75 = vadd.xlane.f32.xlu0 %v1260_v25 }
  0x36   :  { %109 = vadd.xlane.f32.xlu1 %v1267_v26  ;;  %77 = vadd.xlane.f32.xlu0 %v1272_v27 }
  0x3a   :  { %111 = vadd.xlane.f32.xlu1 %v1279_v28  ;;  %79 = vadd.xlane.f32.xlu0 %v1284_v29 }
  0x3e   :  { %113 = vadd.xlane.f32.xlu1 %v1291_v30  ;;  %81 = vadd.xlane.f32.xlu0 %v1296_v31 }
  0x8f   :  { %v54_v50 = vpop.xlane.xlu1 %53  ;;  %v52_v51 = vpop.xlane.xlu0 %51 }
  0x93   :  { %v86_v52 = vpop.xlane.xlu1 %85  ;;  %v84_v53 = vpop.xlane.xlu0 %83 }
  0x94   :  { %v116_v54 = vadd.f32 %v86_v52, %v54_v50  ;;  %v115_v55 = vadd.f32 %v84_v53, %v52_v51 }
  0x96   :  { %v132_v56 = vmul.f32 0.00390625, %v116_v54  ;;  %v131_v57 = vmul.f32 0.00390625, %v115_v55 }
  0x97   :  { %v88_v58 = vpop.xlane.xlu1 %87  ;;  %v56_v59 = vpop.xlane.xlu0 %55 }
  0x98   :  { %v1337_v60 = vsub.f32 %v1116_v1, %v131_v57  ;;  %v1340_v61 = vsub.f32 %v1128_v3, %v131_v57  ;;  %v117_v62 = vadd.f32 %v88_v58, %v56_v59  ;;  %v1343_v63 = vsub.f32 %v1111_v0, %v132_v56  ;;  %v393_v58 = vld [vmem:[%s1623_s2 + $0x30] sm:$0xff]  ;;  %v394_v59 = vld [vmem:[%s1623_s2 + $0x38] sm:$0xff] }
  0x99   :  { %v1346_v32 = vsub.f32 %v1123_v2, %v132_v56 }
  0x9a   :  { %v227_v33 = vmul.f32 %v1340_v61, %v1340_v61  ;;  %v179_v34 = vmul.f32 %v1337_v60, %v1337_v60  ;;  %v133_v35 = vmul.f32 0.00390625, %v117_v62  ;;  %v180_v39 = vmul.f32 %v1343_v63, %v1343_v63 }
  0x9b   :  { %v90_v36 = vpop.xlane.xlu1 %89  ;;  %v58_v1 = vpop.xlane.xlu0 %57  ;;  %v228_v38 = vmul.f32 %v1346_v32, %v1346_v32 }
  0x9c   :  { %243 = vadd.xlane.f32.xlu1 %v227_v33  ;;  %195 = vadd.xlane.f32.xlu0 %v179_v34  ;;  %v118_v3 = vadd.f32 %v90_v36, %v58_v1  ;;  %v1353_v37 = vsub.f32 %v1140_v5, %v133_v35  ;;  %v1356_v0 = vsub.f32 %v1135_v4, %v133_v35  ;;  %v362_v36 = vld [vmem:[%s1622_s1 + $0x38] sm:$0xff] }
  0x9d   :  { %v953_v35 = vpack.c.bf16 %v394_v59, %v393_v58  ;;  %v366_v58 = vld [vmem:[%s1622_s1 + $0x58] sm:$0xff] }
  0x9e   :  { %v134_v2 = vmul.f32 0.00390625, %v118_v3  ;;  %v229_v42 = vmul.f32 %v1356_v0, %v1356_v0  ;;  %v181_v43 = vmul.f32 %v1353_v37, %v1353_v37 }
  0x9f   :  { %v92_v40 = vpop.xlane.xlu1 %91  ;;  %v60_v41 = vpop.xlane.xlu0 %59  ;;  %954 = vmatprep.subr.bf16.mxu1 %v953_v35 }
  0xa0   :  { %v1367_v5 = vsub.f32 %v1152_v7, %v134_v2  ;;  %v1370_v4 = vsub.f32 %v1147_v6, %v134_v2  ;;  %245 = vadd.xlane.f32.xlu1 %v228_v38  ;;  %197 = vadd.xlane.f32.xlu0 %v180_v39  ;;  %v119_v44 = vadd.f32 %v92_v40, %v60_v41  ;;  %v395_v40 = vld [vmem:[%s1623_s2 + $0x40] sm:$0xff]  ;;  %v396_v41 = vld [vmem:[%s1623_s2 + $0x48] sm:$0xff] }
  0xa1   :  { %956 = vmatpush3.bf16.msra.mxu1 %v953_v35 }
  0xa2   :  { %v135_v45 = vmul.f32 0.00390625, %v119_v44  ;;  %v230_v48 = vmul.f32 %v1370_v4, %v1370_v4  ;;  %v182_v49 = vmul.f32 %v1367_v5, %v1367_v5 }
  0xa3   :  { %v94_v46 = vpop.xlane.xlu1 %93  ;;  %v62_v47 = vpop.xlane.xlu0 %61 }
  0xa4   :  { %v1377_v50 = vsub.f32 %v1164_v9, %v135_v45  ;;  %v1380_v7 = vsub.f32 %v1159_v8, %v135_v45  ;;  %247 = vadd.xlane.f32.xlu1 %v229_v42  ;;  %199 = vadd.xlane.f32.xlu0 %v181_v43  ;;  %v120_v6 = vadd.f32 %v94_v46, %v62_v47  ;;  %v364_v46 = vld [vmem:[%s1622_s1 + $0x48] sm:$0xff] }
  0xa5   :  { %v957_v45 = vpack.c.bf16 %v396_v41, %v395_v40  ;;  %v368_v40 = vld [vmem:[%s1622_s1 + $0x68] sm:$0xff] }
  0xa6   :  { %v136_v51 = vmul.f32 0.00390625, %v120_v6  ;;  %v231_v54 = vmul.f32 %v1380_v7, %v1380_v7  ;;  %v183_v55 = vmul.f32 %v1377_v50, %v1377_v50 }
  0xa7   :  { %v96_v52 = vpop.xlane.xlu1 %95  ;;  %v64_v53 = vpop.xlane.xlu0 %63  ;;  %958 = vmatprep.subr.bf16.mxu1 %v957_v45 }
  0xa8   :  { %v1387_v56 = vsub.f32 %v1176_v11, %v136_v51  ;;  %v1390_v9 = vsub.f32 %v1171_v10, %v136_v51  ;;  %249 = vadd.xlane.f32.xlu1 %v230_v48  ;;  %201 = vadd.xlane.f32.xlu0 %v182_v49  ;;  %v121_v8 = vadd.f32 %v96_v52, %v64_v53  ;;  %v361_v11 = vld [vmem:[%s1622_s1 + $0x30] sm:$0xff] }
  0xa9   :  { %v985_v38 = vpack.c.bf16 %v362_v36, %v361_v11  ;;  %960 = vmatpush3.bf16.msra.mxu1 %v957_v45  ;;  %v397_v52 = vld [vmem:[%s1623_s2 + $0x50] sm:$0xff] }
  0xaa   :  { %v137_v57 = vmul.f32 0.00390625, %v121_v8  ;;  %v232_v10 = vmul.f32 %v1390_v9, %v1390_v9  ;;  %v184_v34 = vmul.f32 %v1387_v56, %v1387_v56 }
  0xab   :  { %v98_v62 = vpop.xlane.xlu1 %97  ;;  %v66_v33 = vpop.xlane.xlu0 %65  ;;  %986 = vmatprep.subr.bf16.mxu0 %v985_v38 }
  0xac   :  { %v1409_v1 = vsub.f32 %v1188_v13, %v137_v57  ;;  %v1412_v3 = vsub.f32 %v1183_v12, %v137_v57  ;;  %251 = vadd.xlane.f32.xlu1 %v231_v54  ;;  %203 = vadd.xlane.f32.xlu0 %v183_v55  ;;  %v122_v2 = vadd.f32 %v98_v62, %v66_v33  ;;  %v363_v12 = vld [vmem:[%s1622_s1 + $0x40] sm:$0xff] }
  0xad   :  { %988 = vmatpush3.bf16.msra.mxu0 %v985_v38  ;;  %v989_v6 = vpack.c.bf16 %v364_v46, %v363_v12 }
  0xae   :  { %v138_v39 = vmul.f32 0.00390625, %v122_v2  ;;  %v233_v43 = vmul.f32 %v1412_v3, %v1412_v3  ;;  %v185_v44 = vmul.f32 %v1409_v1, %v1409_v1 }
  0xaf   :  { %v100_v13 = vpop.xlane.xlu1 %99  ;;  %v68_v42 = vpop.xlane.xlu0 %67  ;;  %990 = vmatprep.subr.bf16.mxu0 %v989_v6 }
  0xb0   :  { %v1431_v47 = vsub.f32 %v1200_v15, %v138_v39  ;;  %v1434_v48 = vsub.f32 %v1195_v14, %v138_v39  ;;  %253 = vadd.xlane.f32.xlu1 %v232_v10  ;;  %205 = vadd.xlane.f32.xlu0 %v184_v34  ;;  %v123_v49 = vadd.f32 %v100_v13, %v68_v42  ;;  %v398_v15 = vld [vmem:[%s1623_s2 + $0x58] sm:$0xff]  ;;  %v365_v14 = vld [vmem:[%s1622_s1 + $0x50] sm:$0xff]  ;;  %v399_v34 = vld [vmem:[%s1623_s2 + $0x60] sm:$0xff] }
  0xb1   :  { %v961_v57 = vpack.c.bf16 %v398_v15, %v397_v52  ;;  %992 = vmatpush3.bf16.msra.mxu0 %v989_v6  ;;  %v993_v33 = vpack.c.bf16 %v366_v58, %v365_v14  ;;  %v370_v52 = vld [vmem:[%s1622_s1 + $0x78] sm:$0xff] }
  0xb2   :  { %v139_v51 = vmul.f32 0.00390625, %v123_v49  ;;  %v234_v55 = vmul.f32 %v1434_v48, %v1434_v48  ;;  %v186_v8 = vmul.f32 %v1431_v47, %v1431_v47 }
  0xb3   :  { %v102_v53 = vpop.xlane.xlu1 %101  ;;  %v70_v54 = vpop.xlane.xlu0 %69  ;;  %962 = vmatprep.subr.bf16.mxu1 %v961_v57  ;;  %994 = vmatprep.subr.bf16.mxu0 %v993_v33 }
  0xb4   :  { %v1453_v59 = vsub.f32 %v1212_v17, %v139_v51  ;;  %v1456_v11 = vsub.f32 %v1207_v16, %v139_v51  ;;  %255 = vadd.xlane.f32.xlu1 %v233_v43  ;;  %207 = vadd.xlane.f32.xlu0 %v185_v44  ;;  %v124_v62 = vadd.f32 %v102_v53, %v70_v54  ;;  %v400_v17 = vld [vmem:[%s1623_s2 + $0x68] sm:$0xff]  ;;  %v367_v16 = vld [vmem:[%s1622_s1 + $0x60] sm:$0xff]  ;;  %v401_v44 = vld [vmem:[%s1623_s2 + $0x70] sm:$0xff] }
  0xb5   :  { %964 = vmatpush3.bf16.msra.mxu1 %v961_v57  ;;  %v965_v39 = vpack.c.bf16 %v400_v17, %v399_v34  ;;  %996 = vmatpush3.bf16.msra.mxu0 %v993_v33  ;;  %v997_v42 = vpack.c.bf16 %v368_v40, %v367_v16 }
  0xb6   :  { %v140_v10 = vmul.f32 0.00390625, %v124_v62  ;;  %v235_v2 = vmul.f32 %v1456_v11, %v1456_v11  ;;  %v187_v38 = vmul.f32 %v1453_v59, %v1453_v59 }
  0xb7   :  { %v104_v35 = vpop.xlane.xlu1 %103  ;;  %v72_v36 = vpop.xlane.xlu0 %71  ;;  %966 = vmatprep.subr.bf16.mxu1 %v965_v39  ;;  %998 = vmatprep.subr.bf16.mxu0 %v997_v42 }
  0xb8   :  { %v1475_v41 = vsub.f32 %v1224_v19, %v140_v10  ;;  %v1478_v12 = vsub.f32 %v1219_v18, %v140_v10  ;;  %257 = vadd.xlane.f32.xlu1 %v234_v55  ;;  %209 = vadd.xlane.f32.xlu0 %v186_v8  ;;  %v125_v13 = vadd.f32 %v104_v35, %v72_v36  ;;  %v402_v19 = vld [vmem:[%s1623_s2 + $0x78] sm:$0xff]  ;;  %v369_v18 = vld [vmem:[%s1622_s1 + $0x70] sm:$0xff] }
  0xb9   :  { %968 = vmatpush3.bf16.msra.mxu1 %v965_v39  ;;  %v969_v51 = vpack.c.bf16 %v402_v19, %v401_v44  ;;  %1000 = vmatpush3.bf16.msra.mxu0 %v997_v42  ;;  %v1001_v54 = vpack.c.bf16 %v370_v52, %v369_v18 }
  0xba   :  { %v141_v43 = vmul.f32 0.00390625, %v125_v13  ;;  %v236_v49 = vmul.f32 %v1478_v12, %v1478_v12  ;;  %v188_v6 = vmul.f32 %v1475_v41, %v1475_v41 }
  0xbb   :  { %v106_v45 = vpop.xlane.xlu1 %105  ;;  %v74_v46 = vpop.xlane.xlu0 %73  ;;  %970 = vmatprep.subr.bf16.mxu1 %v969_v51  ;;  %1002 = vmatprep.subr.bf16.mxu0 %v1001_v54 }
  0xbc   :  { %v1497_v15 = vsub.f32 %v1236_v21, %v141_v43  ;;  %v1500_v14 = vsub.f32 %v1231_v20, %v141_v43  ;;  %259 = vadd.xlane.f32.xlu1 %v235_v2  ;;  %211 = vadd.xlane.f32.xlu0 %v187_v38  ;;  %v126_v53 = vadd.f32 %v106_v45, %v74_v46 }
  0xbd   :  { %972 = vmatpush3.bf16.msra.mxu1 %v969_v51  ;;  %1004 = vmatpush3.bf16.msra.mxu0 %v1001_v54 }
  0xbe   :  { %v142_v55 = vmul.f32 0.00390625, %v126_v53  ;;  %v237_v58 = vmul.f32 %v1500_v14, %v1500_v14  ;;  %v189_v21 = vmul.f32 %v1497_v15, %v1497_v15 }
  0xbf   :  { %v108_v8 = vpop.xlane.xlu1 %107  ;;  %v76_v57 = vpop.xlane.xlu0 %75 }
  0xc0   :  { %v1507_v20 = vsub.f32 %v1248_v23, %v142_v55  ;;  %v1510_v62 = vsub.f32 %v1243_v22, %v142_v55  ;;  %261 = vadd.xlane.f32.xlu1 %v236_v49  ;;  %213 = vadd.xlane.f32.xlu0 %v188_v6  ;;  %v127_v33 = vadd.f32 %v108_v8, %v76_v57 }
  0xc2   :  { %v143_v10 = vmul.f32 0.00390625, %v127_v33  ;;  %v238_v16 = vmul.f32 %v1510_v62, %v1510_v62  ;;  %v190_v35 = vmul.f32 %v1507_v20, %v1507_v20 }
  0xc3   :  { %v110_v34 = vpop.xlane.xlu1 %109  ;;  %v78_v17 = vpop.xlane.xlu0 %77 }
  0xc4   :  { %v1517_v36 = vsub.f32 %v1260_v25, %v143_v10  ;;  %v1520_v23 = vsub.f32 %v1255_v24, %v143_v10  ;;  %263 = vadd.xlane.f32.xlu1 %v237_v58  ;;  %215 = vadd.xlane.f32.xlu0 %v189_v21  ;;  %v128_v22 = vadd.f32 %v110_v34, %v78_v17 }
  0xc6   :  { %v144_v2 = vmul.f32 0.00390625, %v128_v22  ;;  %v239_v40 = vmul.f32 %v1520_v23, %v1520_v23  ;;  %v191_v13 = vmul.f32 %v1517_v36, %v1517_v36 }
  0xc7   :  { %v112_v38 = vpop.xlane.xlu1 %111  ;;  %v80_v39 = vpop.xlane.xlu0 %79 }
  0xc8   :  { %v1527_v42 = vsub.f32 %v1272_v27, %v144_v2  ;;  %v1530_v25 = vsub.f32 %v1267_v26, %v144_v2  ;;  %265 = vadd.xlane.f32.xlu1 %v238_v16  ;;  %217 = vadd.xlane.f32.xlu0 %v190_v35  ;;  %v129_v24 = vadd.f32 %v112_v38, %v80_v39 }
  0xca   :  { %v145_v43 = vmul.f32 0.00390625, %v129_v24  ;;  %v240_v18 = vmul.f32 %v1530_v25, %v1530_v25  ;;  %v192_v45 = vmul.f32 %v1527_v42, %v1527_v42 }
  0xcb   :  { %v114_v44 = vpop.xlane.xlu1 %113  ;;  %v82_v19 = vpop.xlane.xlu0 %81 }
  0xcc   :  { %v1537_v46 = vsub.f32 %v1284_v29, %v145_v43  ;;  %v1540_v27 = vsub.f32 %v1279_v28, %v145_v43  ;;  %267 = vadd.xlane.f32.xlu1 %v239_v40  ;;  %219 = vadd.xlane.f32.xlu0 %v191_v13  ;;  %v130_v26 = vadd.f32 %v114_v44, %v82_v19 }
  0xce   :  { %v146_v49 = vmul.f32 0.00390625, %v130_v26  ;;  %v241_v6 = vmul.f32 %v1540_v27, %v1540_v27  ;;  %v193_v29 = vmul.f32 %v1537_v46, %v1537_v46 }
  0xd0   :  { %v1545_v51 = vsub.f32 %v1296_v31, %v146_v49  ;;  %v1548_v52 = vsub.f32 %v1291_v30, %v146_v49  ;;  %269 = vadd.xlane.f32.xlu1 %v240_v18  ;;  %221 = vadd.xlane.f32.xlu0 %v192_v45 }
  0xd2   :  { %v242_v28 = vmul.f32 %v1548_v52, %v1548_v52  ;;  %v194_v53 = vmul.f32 %v1545_v51, %v1545_v51 }
  0xd4   :  { %271 = vadd.xlane.f32.xlu1 %v241_v6  ;;  %223 = vadd.xlane.f32.xlu0 %v193_v29 }
  0xd8   :  { %273 = vadd.xlane.f32.xlu1 %v242_v28  ;;  %225 = vadd.xlane.f32.xlu0 %v194_v53 }
 0x129   :  { %v244_v31 = vpop.xlane.xlu1 %243  ;;  %v196_v54 = vpop.xlane.xlu0 %195 }
 0x12a   :  { %v275_v55 = vadd.f32 %v244_v31, %v196_v54 }
 0x12c   :  { %v291_v30 = vmul.f32 0.00390625, %v275_v55 }
 0x12d   :  { %v246_v8 = vpop.xlane.xlu1 %245  ;;  %v198_v57 = vpop.xlane.xlu0 %197 }
 0x12e   :  { %v307_v58 = vadd.f32 1e-05, %v291_v30  ;;  %v276_v21 = vadd.f32 %v246_v8, %v198_v57 }
 0x130   :  { %1024 = vrsqrt.f32 %v307_v58  ;;  %v292_v33 = vmul.f32 0.00390625, %v276_v21 }
 0x131   :  { %v248_v10 = vpop.xlane.xlu1 %247  ;;  %v200_v34 = vpop.xlane.xlu0 %199 }
 0x132   :  { %v308_v17 = vadd.f32 1e-05, %v292_v33  ;;  %v277_v16 = vadd.f32 %v248_v10, %v200_v34 }
 0x134   :  { %1026 = vrsqrt.f32 %v308_v17  ;;  %v293_v35 = vmul.f32 0.00390625, %v277_v16 }
 0x135   :  { %v250_v22 = vpop.xlane.xlu1 %249  ;;  %v202_v2 = vpop.xlane.xlu0 %201 }
 0x136   :  { %v309_v38 = vadd.f32 1e-05, %v293_v35  ;;  %v278_v39 = vadd.f32 %v250_v22, %v202_v2 }
 0x138   :  { %1028 = vrsqrt.f32 %v309_v38  ;;  %v294_v40 = vmul.f32 0.00390625, %v278_v39 }
 0x139   :  { %v252_v13 = vpop.xlane.xlu1 %251  ;;  %v204_v24 = vpop.xlane.xlu0 %203 }
 0x13a   :  { %v1025_v43 = vpop.eup %1024  ;;  %v310_v44 = vadd.f32 1e-05, %v294_v40  ;;  %v279_v19 = vadd.f32 %v252_v13, %v204_v24 }
 0x13b   :  { %v371_v18 = vmul.f32 %v1025_v43, %v1340_v61  ;;  %v339_v45 = vmul.f32 %v1025_v43, %v1337_v60 }
 0x13c   :  { %1030 = vrsqrt.f32 %v310_v44  ;;  %v295_v26 = vmul.f32 0.00390625, %v279_v19 }
 0x13d   :  { %v254_v49 = vpop.xlane.xlu1 %253  ;;  %861 = vmatprep.mubr.f32.mxu1 %v371_v18  ;;  %917 = vmatprep.mubr.f32.mxu0 %v339_v45  ;;  %v206_v6 = vpop.xlane.xlu0 %205 }
 0x13e   :  { %v1027_v29 = vpop.eup %1026  ;;  %v311_v28 = vadd.f32 1e-05, %v295_v26  ;;  %v280_v53 = vadd.f32 %v254_v49, %v206_v6 }
 0x13f   :  { %v372_v31 = vmul.f32 %v1027_v29, %v1346_v32  ;;  %v340_v54 = vmul.f32 %v1027_v29, %v1343_v63 }
 0x140   :  { %1032 = vrsqrt.f32 %v311_v28  ;;  %v296_v55 = vmul.f32 0.00390625, %v280_v53 }
 0x141   :  { %v256_v30 = vpop.xlane.xlu1 %255  ;;  %862 = vmatmul.mubr.f32.vlgmr.msra.gmra.mrb[0].mxu1 %v372_v31  ;;  %918 = vmatmul.mubr.f32.vlgmr.msra.gmra.mrb[0].mxu0 %v340_v54  ;;  %v208_v61 = vpop.xlane.xlu0 %207 }
 0x142   :  { %v1029_v60 = vpop.eup %1028  ;;  %v312_v8 = vadd.f32 1e-05, %v296_v55  ;;  %v281_v57 = vadd.f32 %v256_v30, %v208_v61 }
 0x143   :  { %v373_v58 = vmul.f32 %v1029_v60, %v1356_v0  ;;  %v341_v21 = vmul.f32 %v1029_v60, %v1353_v37 }
 0x144   :  { %1034 = vrsqrt.f32 %v312_v8  ;;  %v297_v33 = vmul.f32 0.00390625, %v281_v57 }
 0x145   :  { %v258_v10 = vpop.xlane.xlu1 %257  ;;  %864 = vmatprep.mubr.f32.mxu1 %v373_v58  ;;  %920 = vmatprep.mubr.f32.mxu0 %v341_v21  ;;  %v210_v32 = vpop.xlane.xlu0 %209 }
 0x146   :  { %v1031_v63 = vpop.eup %1030  ;;  %v313_v34 = vadd.f32 1e-05, %v297_v33  ;;  %v282_v17 = vadd.f32 %v258_v10, %v210_v32 }
 0x147   :  { %v374_v16 = vmul.f32 %v1031_v63, %v1370_v4  ;;  %v342_v35 = vmul.f32 %v1031_v63, %v1367_v5 }
 0x148   :  { %1036 = vrsqrt.f32 %v313_v34  ;;  %v298_v22 = vmul.f32 0.00390625, %v282_v17 }
 0x149   :  { %v260_v2 = vpop.xlane.xlu1 %259  ;;  %865 = vmatmul.mubr.f32.gmra.mrb[2].mxu1 %v374_v16  ;;  %921 = vmatmul.mubr.f32.gmra.mrb[2].mxu0 %v342_v35  ;;  %v212_v0 = vpop.xlane.xlu0 %211 }
 0x14a   :  { %v1033_v37 = vpop.eup %1032  ;;  %v314_v38 = vadd.f32 1e-05, %v298_v22  ;;  %v283_v39 = vadd.f32 %v260_v2, %v212_v0 }
 0x14b   :  { %v375_v40 = vmul.f32 %v1033_v37, %v1380_v7  ;;  %v343_v13 = vmul.f32 %v1033_v37, %v1377_v50 }
 0x14c   :  { %1038 = vrsqrt.f32 %v314_v38  ;;  %v299_v24 = vmul.f32 0.00390625, %v283_v39 }
 0x14d   :  { %v262_v43 = vpop.xlane.xlu1 %261  ;;  %867 = vmatprep.mubr.f32.mxu1 %v375_v40  ;;  %923 = vmatprep.mubr.f32.mxu0 %v343_v13  ;;  %v214_v4 = vpop.xlane.xlu0 %213 }
 0x14e   :  { %v1035_v5 = vpop.eup %1034  ;;  %v315_v44 = vadd.f32 1e-05, %v299_v24  ;;  %v284_v19 = vadd.f32 %v262_v43, %v214_v4 }
 0x14f   :  { %v376_v18 = vmul.f32 %v1035_v5, %v1390_v9  ;;  %v344_v45 = vmul.f32 %v1035_v5, %v1387_v56 }
 0x150   :  { %1040 = vrsqrt.f32 %v315_v44  ;;  %v300_v26 = vmul.f32 0.00390625, %v284_v19 }
 0x151   :  { %v264_v49 = vpop.xlane.xlu1 %263  ;;  %868 = vmatmul.mubr.f32.gmra.mrb[4].mxu1 %v376_v18  ;;  %924 = vmatmul.mubr.f32.gmra.mrb[4].mxu0 %v344_v45  ;;  %v216_v7 = vpop.xlane.xlu0 %215 }
 0x152   :  { %v1037_v50 = vpop.eup %1036  ;;  %v316_v6 = vadd.f32 1e-05, %v300_v26  ;;  %v285_v29 = vadd.f32 %v264_v49, %v216_v7 }
 0x153   :  { %v377_v28 = vmul.f32 %v1037_v50, %v1412_v3  ;;  %v345_v53 = vmul.f32 %v1037_v50, %v1409_v1 }
 0x154   :  { %1042 = vrsqrt.f32 %v316_v6  ;;  %v301_v31 = vmul.f32 0.00390625, %v285_v29 }
 0x155   :  { %v266_v54 = vpop.xlane.xlu1 %265  ;;  %870 = vmatprep.mubr.f32.mxu1 %v377_v28  ;;  %926 = vmatprep.mubr.f32.mxu0 %v345_v53  ;;  %v218_v9 = vpop.xlane.xlu0 %217 }
 0x156   :  { %v1039_v56 = vpop.eup %1038  ;;  %v317_v55 = vadd.f32 1e-05, %v301_v31  ;;  %v286_v30 = vadd.f32 %v266_v54, %v218_v9 }
 0x157   :  { %v378_v61 = vmul.f32 %v1039_v56, %v1434_v48  ;;  %v346_v60 = vmul.f32 %v1039_v56, %v1431_v47 }
 0x158   :  { %1044 = vrsqrt.f32 %v317_v55  ;;  %v302_v8 = vmul.f32 0.00390625, %v286_v30 }
 0x159   :  { %v268_v57 = vpop.xlane.xlu1 %267  ;;  %871 = vmatmul.mubr.f32.gmra.mrb[6].mxu1 %v378_v61  ;;  %927 = vmatmul.mubr.f32.gmra.mrb[6].mxu0 %v346_v60  ;;  %v220_v3 = vpop.xlane.xlu0 %219 }
 0x15a   :  { %v1041_v1 = vpop.eup %1040  ;;  %v318_v58 = vadd.f32 1e-05, %v302_v8  ;;  %v287_v21 = vadd.f32 %v268_v57, %v220_v3 }
 0x15b   :  { %v379_v33 = vmul.f32 %v1041_v1, %v1456_v11  ;;  %v347_v10 = vmul.f32 %v1041_v1, %v1453_v59 }
 0x15c   :  { %1046 = vrsqrt.f32 %v318_v58  ;;  %v303_v32 = vmul.f32 0.00390625, %v287_v21 }
 0x15d   :  { %v270_v63 = vpop.xlane.xlu1 %269  ;;  %873 = vmatprep.mubr.f32.mxu1 %v379_v33  ;;  %929 = vmatprep.mubr.f32.mxu0 %v347_v10  ;;  %v222_v48 = vpop.xlane.xlu0 %221 }
 0x15e   :  { %v1043_v47 = vpop.eup %1042  ;;  %v319_v34 = vadd.f32 1e-05, %v303_v32  ;;  %v288_v17 = vadd.f32 %v270_v63, %v222_v48 }
 0x15f   :  { %v380_v16 = vmul.f32 %v1043_v47, %v1478_v12  ;;  %v348_v35 = vmul.f32 %v1043_v47, %v1475_v41 }
 0x160   :  { %1048 = vrsqrt.f32 %v319_v34  ;;  %v304_v22 = vmul.f32 0.00390625, %v288_v17 }
 0x161   :  { %v272_v2 = vpop.xlane.xlu1 %271  ;;  %874 = vmatmul.mubr.f32.gmra.mrb[8].mxu1 %v380_v16  ;;  %930 = vmatmul.mubr.f32.gmra.mrb[8].mxu0 %v348_v35  ;;  %v224_v11 = vpop.xlane.xlu0 %223 }
 0x162   :  { %v1045_v59 = vpop.eup %1044  ;;  %v320_v0 = vadd.f32 1e-05, %v304_v22  ;;  %v289_v37 = vadd.f32 %v272_v2, %v224_v11 }
 0x163   :  { %v381_v38 = vmul.f32 %v1045_v59, %v1500_v14  ;;  %v349_v39 = vmul.f32 %v1045_v59, %v1497_v15 }
 0x164   :  { %1050 = vrsqrt.f32 %v320_v0  ;;  %v305_v40 = vmul.f32 0.00390625, %v289_v37 }
 0x165   :  { %v274_v13 = vpop.xlane.xlu1 %273  ;;  %876 = vmatprep.mubr.f32.mxu1 %v381_v38  ;;  %932 = vmatprep.mubr.f32.mxu0 %v349_v39  ;;  %v226_v12 = vpop.xlane.xlu0 %225 }
 0x166   :  { %v1047_v41 = vpop.eup %1046  ;;  %v321_v24 = vadd.f32 1e-05, %v305_v40  ;;  %v290_v43 = vadd.f32 %v274_v13, %v226_v12 }
 0x167   :  { %v382_v4 = vmul.f32 %v1047_v41, %v1510_v62  ;;  %v350_v5 = vmul.f32 %v1047_v41, %v1507_v20 }
 0x168   :  { %1052 = vrsqrt.f32 %v321_v24  ;;  %v306_v44 = vmul.f32 0.00390625, %v290_v43 }
 0x169   :  { %877 = vmatmul.mubr.f32.gmra.mrb[10].mxu1 %v382_v4  ;;  %933 = vmatmul.mubr.f32.gmra.mrb[10].mxu0 %v350_v5 }
 0x16a   :  { %v1049_v14 = vpop.eup %1048  ;;  %v322_v19 = vadd.f32 1e-05, %v306_v44 }
 0x16b   :  { %v383_v15 = vmul.f32 %v1049_v14, %v1520_v23  ;;  %v351_v18 = vmul.f32 %v1049_v14, %v1517_v36 }
 0x16c   :  { %1054 = vrsqrt.f32 %v322_v19 }
 0x16d   :  { %879 = vmatprep.mubr.f32.mxu1 %v383_v15  ;;  %935 = vmatprep.mubr.f32.mxu0 %v351_v18 }
 0x16e   :  { %v1051_v45 = vpop.eup %1050 }
 0x16f   :  { %v384_v26 = vmul.f32 %v1051_v45, %v1530_v25  ;;  %v352_v62 = vmul.f32 %v1051_v45, %v1527_v42  ;;  %v1591_v42 = vld [vmem:[%s1624_s3] ss:$0 sm:$0xff]  ;;  %s1080_s3 = smov [#allocation2]  }
 0x170   :  { %s737_s10 = sshll.u32 %s1080_s3, 4  ;;  %s738_s10 = int_to_ptr.vmem [resolvable:$true] %s737_s10 }
 0x171   :  { %880 = vmatmul.mubr.f32.gmra.mrb[12].mxu1 %v384_v26  ;;  %936 = vmatmul.mubr.f32.gmra.mrb[12].mxu0 %v352_v62  ;;  %s1056_s11 = scalar_lea.vmem %s738_s10, 2048  ;;  %p1061_p1 = scmp.lt.s32.totalorder %s738_s10, %s738_s10 }
 0x172   :  { %v1053_v20 = vpop.eup %1052  ;;  %p1057_p0 = scmp.ne.s32.totalorder %s738_s10, %s1056_s11  ;;  %p1062_p2 = scmp.lt.s32.totalorder %s1056_s11, %s1056_s11 }
 0x173   :  { %v385_v49 = vmul.f32 %v1053_v20, %v1540_v27  ;;  %v353_v7 = vmul.f32 %v1053_v20, %v1537_v46 }
 0x174   :  { %p1063_p3 = por %p1062_p2, %p1061_p1 }
 0x175   :  { %882 = vmatprep.mubr.f32.mxu1 %v385_v49  ;;  %938 = vmatprep.mubr.f32.mxu0 %v353_v7 }
 0x176   :  { %v1055_v23 = vpop.eup %1054  ;;  %p1064_p4 = pnand %p1063_p3, %p1057_p0 }
 0x177   :  { %v386_v36 = vmul.f32 %v1055_v23, %v1548_v52  ;;  %v354_v50 = vmul.f32 %v1055_v23, %v1545_v51 }
 0x179   :  { %883 = vmatmul.mubr.f32.gmra.mrb[14].mxu1 %v386_v36  ;;  %939 = vmatmul.mubr.f32.gmra.mrb[14].mxu0 %v354_v50 }
 0x214   :  { %v863_v6 = vpop.f32.mrb[0].mxu1  ;;  %v919_v25 = vpop.f32.mrb[0].mxu0 }
 0x215   :  { %v620_v29 = vadd.f32 %v919_v25, %v863_v6  ;;  %v469_v27 = vpop.f32.mrb[1].mxu1  ;;  %v614_v28 = vpop.f32.mrb[1].mxu0 }
 0x216   :  { %v615_v46 = vadd.f32 %v614_v28, %v469_v27 }
 0x217   :  { %v701_v53 = vadd.f32 %v1591_v42, %v620_v29 }
 0x218   :  { %v700_v31 = vadd.f32 %v1591_v42, %v615_v46 }
 0x219   :  { %717 = vst [vmem:[#allocation2 + $0x8] sm:$0xff] %v701_v53 }
 0x21a   :  { %716 = vst [vmem:[#allocation2] sm:$0xff] %v700_v31 }
 0x21c   :  { %v866_v51 = vpop.f32.mrb[2].mxu1  ;;  %v922_v52 = vpop.f32.mrb[2].mxu0 }
 0x21d   :  { %v630_v54 = vadd.f32 %v922_v52, %v866_v51  ;;  %v479_v9 = vpop.f32.mrb[3].mxu1  ;;  %v624_v56 = vpop.f32.mrb[3].mxu0 }
 0x21e   :  { %v625_v55 = vadd.f32 %v624_v56, %v479_v9 }
 0x21f   :  { %v703_v30 = vadd.f32 %v1591_v42, %v630_v54 }
 0x220   :  { %v702_v61 = vadd.f32 %v1591_v42, %v625_v55 }
 0x221   :  { %719 = vst [vmem:[#allocation2 + $0x18] sm:$0xff] %v703_v30 }
 0x222   :  { %718 = vst [vmem:[#allocation2 + $0x10] sm:$0xff] %v702_v61 }
 0x224   :  { %v869_v60 = vpop.f32.mrb[4].mxu1  ;;  %v925_v8 = vpop.f32.mrb[4].mxu0 }
 0x225   :  { %v640_v57 = vadd.f32 %v925_v8, %v869_v60  ;;  %v489_v3 = vpop.f32.mrb[5].mxu1  ;;  %v634_v1 = vpop.f32.mrb[5].mxu0 }
 0x226   :  { %v635_v58 = vadd.f32 %v634_v1, %v489_v3 }
 0x227   :  { %v705_v21 = vadd.f32 %v1591_v42, %v640_v57 }
 0x228   :  { %v704_v33 = vadd.f32 %v1591_v42, %v635_v58 }
 0x229   :  { %721 = vst [vmem:[#allocation2 + $0x28] sm:$0xff] %v705_v21 }
 0x22a   :  { %720 = vst [vmem:[#allocation2 + $0x20] sm:$0xff] %v704_v33 }
 0x22c   :  { %v872_v10 = vpop.f32.mrb[6].mxu1  ;;  %v928_v32 = vpop.f32.mrb[6].mxu0 }
 0x22d   :  { %v650_v63 = vadd.f32 %v928_v32, %v872_v10  ;;  %v499_v48 = vpop.f32.mrb[7].mxu1  ;;  %v644_v47 = vpop.f32.mrb[7].mxu0 }
 0x22e   :  { %v645_v34 = vadd.f32 %v644_v47, %v499_v48 }
 0x22f   :  { %v707_v17 = vadd.f32 %v1591_v42, %v650_v63 }
 0x230   :  { %v706_v16 = vadd.f32 %v1591_v42, %v645_v34 }
 0x231   :  { %723 = vst [vmem:[#allocation2 + $0x38] sm:$0xff] %v707_v17 }
 0x232   :  { %722 = vst [vmem:[#allocation2 + $0x30] sm:$0xff] %v706_v16 }
 0x234   :  { %v875_v35 = vpop.f32.mrb[8].mxu1  ;;  %v931_v22 = vpop.f32.mrb[8].mxu0 }
 0x235   :  { %v660_v2 = vadd.f32 %v931_v22, %v875_v35  ;;  %v509_v11 = vpop.f32.mrb[9].mxu1  ;;  %v654_v59 = vpop.f32.mrb[9].mxu0 }
 0x236   :  { %v655_v0 = vadd.f32 %v654_v59, %v509_v11 }
 0x237   :  { %v709_v37 = vadd.f32 %v1591_v42, %v660_v2 }
 0x238   :  { %v708_v38 = vadd.f32 %v1591_v42, %v655_v0 }
 0x239   :  { %725 = vst [vmem:[#allocation2 + $0x48] sm:$0xff] %v709_v37 }
 0x23a   :  { %724 = vst [vmem:[#allocation2 + $0x40] sm:$0xff] %v708_v38 }
 0x23c   :  { %v878_v39 = vpop.f32.mrb[10].mxu1  ;;  %v934_v40 = vpop.f32.mrb[10].mxu0 }
 0x23d   :  { %v670_v13 = vadd.f32 %v934_v40, %v878_v39  ;;  %v519_v12 = vpop.f32.mrb[11].mxu1  ;;  %v664_v41 = vpop.f32.mrb[11].mxu0 }
 0x23e   :  { %v665_v24 = vadd.f32 %v664_v41, %v519_v12 }
 0x23f   :  { %v711_v43 = vadd.f32 %v1591_v42, %v670_v13 }
 0x240   :  { %v710_v4 = vadd.f32 %v1591_v42, %v665_v24 }
 0x241   :  { %727 = vst [vmem:[#allocation2 + $0x58] sm:$0xff] %v711_v43 }
 0x242   :  { %726 = vst [vmem:[#allocation2 + $0x50] sm:$0xff] %v710_v4 }
 0x244   :  { %v881_v5 = vpop.f32.mrb[12].mxu1  ;;  %v937_v44 = vpop.f32.mrb[12].mxu0 }
 0x245   :  { %v680_v14 = vadd.f32 %v937_v44, %v881_v5  ;;  %v529_v19 = vpop.f32.mrb[13].mxu1  ;;  %v674_v15 = vpop.f32.mrb[13].mxu0 }
 0x246   :  { %v675_v18 = vadd.f32 %v674_v15, %v529_v19 }
 0x247   :  { %v713_v45 = vadd.f32 %v1591_v42, %v680_v14 }
 0x248   :  { %v712_v26 = vadd.f32 %v1591_v42, %v675_v18 }
 0x249   :  { %729 = vst [vmem:[#allocation2 + $0x68] sm:$0xff] %v713_v45 }
 0x24a   :  { %728 = vst [vmem:[#allocation2 + $0x60] sm:$0xff] %v712_v26 }
 0x24c   :  { %v884_v62 = vpop.f32.mrb[14].mxu1  ;;  %v940_v20 = vpop.f32.mrb[14].mxu0 }
 0x24d   :  { %v690_v49 = vadd.f32 %v940_v20, %v884_v62  ;;  %v539_v7 = vpop.f32.mrb[15].mxu1  ;;  %v684_v23 = vpop.f32.mrb[15].mxu0 }
 0x24e   :  { %v685_v36 = vadd.f32 %v684_v23, %v539_v7 }
 0x24f   :  { %v715_v50 = vadd.f32 %v1591_v42, %v690_v49 }
 0x250   :  { %v714_v6 = vadd.f32 %v1591_v42, %v685_v36 }
 0x251   :  { %731 = vst [vmem:[#allocation2 + $0x78] sm:$0xff] %v715_v50 }
 0x252   :  { %730 = vst [vmem:[#allocation2 + $0x70] sm:$0xff] %v714_v6 }
 0x253   :  { %1067 = shalt.err (!%p1064_p4)
}
 0x254   :  { %s1068_s14 = scalar_lea.hbm %s1625_s4, 2048 }
 0x255   :  { %p1069_p5 = scmp.ne.s32.totalorder %s1625_s4, %s1068_s14  ;;  %p1072_p6 = scmp.lt.u32.totalorder %s1068_s14, %s1625_s4 }
 0x257   :  { %p1074_p7 = pnand %p1072_p6, %p1069_p5 }
 0x259   :  { %1077 = shalt.err (!%p1074_p7)
}
 0x25a   :  { %s1081_s19 = smov 128   ;;  %s1082_s20 = smov 8  }
 0x25b   :  { %743 = dma.vmem_to_hbm [thread:$0]  %s738_s10, 2048, %s1625_s4, [#allocation3], %s1081_s19, %s1081_s19, %s1082_s20  }
 0x25c   :  { %1078 = dma.done.wait [#allocation3], 2048  }
 0x25d   :  { %1079 = vsyncadd [#allocation3], 4294965248 }
 0x25e   :  { %747 = vsyncpa [#allocation3], 1 }

</bundles_post_ra>
